<compile_context>
chip_gen: v5e
topology: v5e:2x2
jax: 0.10.0
libtpu: 0.0.40
codegen_flags: <defaults>
</compile_context>

<pallas_src>
import functools

import jax
import jax.numpy as jnp
from jax.experimental import pallas as pl
from jax.experimental.pallas import tpu as pltpu


def _l1_kernel(pred_ref, lab_ref, loss_ref, cnt_ref, *, ignore_index,
               normalize, hw, tile_p, eps=1e-12):
    """One grid step processes one batch element's tile of pixels.

    pred_ref : (C, TP) VMEM   predictions (channels on sublanes, pixels on lanes)
    lab_ref  : (C, TP) VMEM   labels
    loss_ref : (1, TP) VMEM   per-lane partial sums of masked |diff| (resident acc)
    cnt_ref  : (1, TP) VMEM   per-lane partial counts of valid pixels (resident acc)
    """
    i = pl.program_id(1)

    @pl.when(i == 0)
    def _():
        loss_ref[...] = jnp.zeros_like(loss_ref)
        cnt_ref[...] = jnp.zeros_like(cnt_ref)

    x = pred_ref[...].astype(jnp.float32)     # (C, TP)
    y = lab_ref[...].astype(jnp.float32)      # (C, TP)

    # Pixel is valid iff ALL channels != ignore_index AND the lane maps to a
    # real pixel (< hw).  The lane mask also covers the garbage in the padded
    # region of the (possibly out-of-bounds) tail block.
    lane = jax.lax.broadcasted_iota(jnp.int32, (1, tile_p), 1)
    in_range = (i * tile_p + lane) < hw                               # (1, TP)
    not_ign = jnp.all(y != float(ignore_index), axis=0, keepdims=True)
    valid = jnp.logical_and(not_ign, in_range)                        # (1, TP) bool

    if normalize:
        # x / max(||x||_2, eps) == x * rsqrt(max(sum(x^2), eps^2))
        sumsq = jnp.sum(x * x, axis=0, keepdims=True)                 # (1, TP)
        x = x * jax.lax.rsqrt(jnp.maximum(sumsq, eps * eps))

    per_pixel = jnp.sum(jnp.abs(x - y), axis=0, keepdims=True)        # (1, TP)

    loss_ref[...] += jnp.where(valid, per_pixel, 0.0)
    cnt_ref[...] += valid.astype(jnp.float32)


def _round_up(x, m):
    return ((x + m - 1) // m) * m


def _vmem_capacity_bytes():
    try:
        return int(pltpu.get_tpu_info().vmem_capacity_bytes)
    except Exception:
        return 64 << 20   # v7x per-TC physical VMEM; safe minimum across gens


def _pick_tile_p(hw, vmem_cap):
    """Large lane-dense pixel tile (multiple of 128), sized by VMEM budget."""
    hw_r = _round_up(hw, 128)
    budget = vmem_cap // 2                       # leave half of VMEM as headroom
    # Conservative per-lane VMEM cost: 2 input blocks + 2 f32 output blocks,
    # sublane-padded (~32 B/lane each), double-buffered -> ~256 B/lane.
    bytes_per_lane = 256
    cap = max(128, (budget // bytes_per_lane) // 128 * 128)
    return min(hw_r, cap, 131072)


def l1_loss(pred, label, *, normalize=False, ignore_index=255,
            reduction='mean', tile_p=None):
    """Pallas L1 loss with ignore regions (reduction in {'mean', 'sum'})."""
    n, c, h, w = pred.shape
    assert label.shape == pred.shape
    hw = h * w

    # Free reshape — no transpose, no extra HBM traffic.
    pred2 = pred.reshape(n, c, hw)
    lab2 = label.reshape(n, c, hw)

    vmem_cap = _vmem_capacity_bytes()
    if tile_p is None:
        tile_p = _pick_tile_p(hw, vmem_cap)
    else:
        # user tile must satisfy the lane (128) constraint
        tile_p = max(128, _round_up(int(tile_p), 128))

    num_tiles = pl.cdiv(hw, tile_p)    # tail tile masked in-kernel (no jnp.pad)

    # Raise the scoped VMEM limit to fit the chosen tile (esp. v5e's 16 MiB
    # default), but never beyond what the chip physically has.
    est_vmem = 256 * tile_p + (2 << 20)
    vmem_limit = int(min(vmem_cap * 3 // 4, max(32 << 20, est_vmem)))

    kernel = functools.partial(_l1_kernel, ignore_index=ignore_index,
                               normalize=normalize, hw=hw, tile_p=tile_p)

    loss_part, cnt_part = pl.pallas_call(
        kernel,
        out_shape=(jax.ShapeDtypeStruct((n, 1, tile_p), jnp.float32),
                   jax.ShapeDtypeStruct((n, 1, tile_p), jnp.float32)),
        grid_spec=pltpu.PrefetchScalarGridSpec(
            num_scalar_prefetch=0,
            grid=(n, num_tiles),
            in_specs=[
                pl.BlockSpec((None, c, tile_p), lambda b, i: (b, 0, i)),
                pl.BlockSpec((None, c, tile_p), lambda b, i: (b, 0, i)),
            ],
            out_specs=[
                pl.BlockSpec((None, 1, tile_p), lambda b, i: (b, 0, 0)),
                pl.BlockSpec((None, 1, tile_p), lambda b, i: (b, 0, 0)),
            ],
        ),
        compiler_params=pltpu.CompilerParams(
            # batch axis is parallel (shards across TCs on v7x); pixel-tile
            # axis is a reduction into the resident output blocks.
            dimension_semantics=("parallel", "arbitrary"),
            vmem_limit_bytes=vmem_limit),
    )(pred2, lab2)

    total = jnp.sum(loss_part)
    n_valid = jnp.sum(cnt_part)
    if reduction == 'sum':
        return total
    if reduction == 'mean':
        # divide by max(n_valid, 1), matching the PyTorch module.
        return total / jnp.maximum(n_valid, 1.0)
    # TODO(synk): reduction='none' (dynamic-size masked_select output) has no
    # static-shape Pallas equivalent and is not implemented.
    raise NotImplementedError(f"reduction={reduction!r} not supported")


def _reference(pred, label, *, normalize=False, ignore_index=255,
               reduction='mean', eps=1e-12):
    """Pure-JAX reference mirroring the PyTorch module."""
    pred = pred.astype(jnp.float32)
    label = label.astype(jnp.float32)
    if normalize:
        norm = jnp.sqrt(jnp.sum(pred * pred, axis=1, keepdims=True))
        pred = pred / jnp.maximum(norm, eps)
    mask = jnp.all(label != ignore_index, axis=1, keepdims=True)   # (N,1,H,W)
    diff = jnp.abs(pred - label)
    total = jnp.sum(jnp.where(mask, diff, 0.0))
    n_valid = jnp.sum(mask.astype(jnp.float32))
    if reduction == 'sum':
        return total
    return total / jnp.maximum(n_valid, 1.0)


if __name__ == "__main__":
    key = jax.random.PRNGKey(0)
    k1, k2, k3 = jax.random.split(key, 3)

    # shapes consistent with the forward: out/label are (N, C, H, W),
    # ignored pixels carry ignore_index=255 in every channel.
    N, C, H, W = 2, 4, 16, 16
    pred = jax.random.normal(k1, (N, C, H, W), jnp.float32)
    label = jax.random.normal(k2, (N, C, H, W), jnp.float32)
    ign = jax.random.bernoulli(k3, 0.1, (N, 1, H, W))
    label = jnp.where(ign, 255.0, label)

    checks = []
    # reduction='mean' (default module path)
    checks.append((l1_loss(pred, label), _reference(pred, label)))
    # reduction='sum'
    checks.append((l1_loss(pred, label, reduction='sum'),
                   _reference(pred, label, reduction='sum')))
    # normalize=True path (surface normals)
    checks.append((l1_loss(pred, label, normalize=True),
                   _reference(pred, label, normalize=True)))

    # Non-128-divisible H*W with C=3: exercises the in-kernel tail masking
    # (no jnp.pad path anymore) and multi-tile accumulation.
    k4, k5, k6 = jax.random.split(jax.random.PRNGKey(1), 3)
    N2, C2, H2, W2 = 2, 3, 18, 18
    pred2 = jax.random.normal(k4, (N2, C2, H2, W2), jnp.float32)
    label2 = jax.random.normal(k5, (N2, C2, H2, W2), jnp.float32)
    ign2 = jax.random.bernoulli(k6, 0.2, (N2, 1, H2, W2))
    label2 = jnp.where(ign2, 255.0, label2)
    checks.append((l1_loss(pred2, label2, tile_p=128),
                   _reference(pred2, label2)))
    checks.append((l1_loss(pred2, label2, normalize=True, tile_p=128),
                   _reference(pred2, label2, normalize=True)))

    for got, want in checks:
        got = jax.block_until_ready(got)
        want = jax.block_until_ready(want)
        assert jnp.allclose(got, want, rtol=1e-5, atol=1e-5), (got, want)

    print("KERNEL_OK")
</pallas_src>

<mosaic_0001>
module attributes {stable_mosaic.version = 11 : i64} {
  func.func @_l1_kernel(%arg0: i32, %arg1: i32, %arg2: memref<1x4x256xf32, #tpu.memory_space<vmem>>, %arg3: memref<1x4x256xf32, #tpu.memory_space<vmem>>, %arg4: memref<1x1x256xf32, #tpu.memory_space<vmem>>, %arg5: memref<1x1x256xf32, #tpu.memory_space<vmem>>) attributes {dimension_semantics = [#tpu.dimension_semantics<parallel>, #tpu.dimension_semantics<arbitrary>], iteration_bounds = array<i64: 2, 1>, scalar_prefetch = 0 : i64, scratch_operands = 0 : i64, tpu.core_type = #tpu.core_type<tc>, window_params = [{transform_indices = @transform_0, window_bounds = array<i64: 1, 4, 256>}, {transform_indices = @transform_1, window_bounds = array<i64: 1, 4, 256>}, {transform_indices = @transform_2, window_bounds = array<i64: 1, 1, 256>}, {transform_indices = @transform_3, window_bounds = array<i64: 1, 1, 256>}]} {
    %c0_i32 = arith.constant 0 : i32
    %0 = arith.cmpi eq, %arg1, %c0_i32 : i32
    %1 = arith.extui %0 : i1 to i32
    %c0_i32_0 = arith.constant 0 : i32
    %2 = arith.cmpi ne, %1, %c0_i32_0 : i32
    scf.if %2 {
      %cst_25 = arith.constant 0.000000e+00 : f32
      %43 = vector.broadcast %cst_25 : f32 to vector<1x256xf32>
      %c0_26 = arith.constant 0 : index
      %c0_27 = arith.constant 0 : index
      %c0_28 = arith.constant 0 : index
      %44 = vector.load %arg4[%c0_26, %c0_27, %c0_28] : memref<1x1x256xf32, #tpu.memory_space<vmem>>, vector<1x1x256xf32>
      %45 = vector.shape_cast %44 : vector<1x1x256xf32> to vector<1x256xf32>
      %46 = vector.shape_cast %43 : vector<1x256xf32> to vector<1x1x256xf32>
      tpu.vector_store %arg4[%c0_26, %c0_27, %c0_28], %46 {strides = array<i32>} : memref<1x1x256xf32, #tpu.memory_space<vmem>>, vector<1x1x256xf32>,
      %cst_29 = arith.constant 0.000000e+00 : f32
      %47 = vector.broadcast %cst_29 : f32 to vector<1x256xf32>
      %c0_30 = arith.constant 0 : index
      %c0_31 = arith.constant 0 : index
      %c0_32 = arith.constant 0 : index
      %48 = vector.load %arg5[%c0_30, %c0_31, %c0_32] : memref<1x1x256xf32, #tpu.memory_space<vmem>>, vector<1x1x256xf32>
      %49 = vector.shape_cast %48 : vector<1x1x256xf32> to vector<1x256xf32>
      %50 = vector.shape_cast %47 : vector<1x256xf32> to vector<1x1x256xf32>
      tpu.vector_store %arg5[%c0_30, %c0_31, %c0_32], %50 {strides = array<i32>} : memref<1x1x256xf32, #tpu.memory_space<vmem>>, vector<1x1x256xf32>,
    } else {
    }
    %c0 = arith.constant 0 : index
    %c0_1 = arith.constant 0 : index
    %c0_2 = arith.constant 0 : index
    %3 = vector.load %arg2[%c0, %c0_1, %c0_2] : memref<1x4x256xf32, #tpu.memory_space<vmem>>, vector<1x4x256xf32>
    %4 = vector.shape_cast %3 : vector<1x4x256xf32> to vector<4x256xf32>
    %c0_3 = arith.constant 0 : index
    %c0_4 = arith.constant 0 : index
    %c0_5 = arith.constant 0 : index
    %5 = vector.load %arg3[%c0_3, %c0_4, %c0_5] : memref<1x4x256xf32, #tpu.memory_space<vmem>>, vector<1x4x256xf32>
    %6 = vector.shape_cast %5 : vector<1x4x256xf32> to vector<4x256xf32>
    %7 = tpu.iota {dimensions = array<i32: 1>} : vector<1x256xi32>
    %c256_i32 = arith.constant 256 : i32
    %8 = arith.muli %arg1, %c256_i32 : i32
    %9 = vector.broadcast %8 : i32 to vector<1x256xi32>
    %10 = arith.addi %9, %7 : vector<1x256xi32>
    %c256_i32_6 = arith.constant 256 : i32
    %11 = vector.broadcast %c256_i32_6 : i32 to vector<1x256xi32>
    %12 = arith.cmpi slt, %10, %11 : vector<1x256xi32>
    %cst = arith.constant 2.550000e+02 : f32
    %13 = vector.broadcast %cst : f32 to vector<4x256xf32>
    %14 = arith.cmpf one, %6, %13 : vector<4x256xf32>
    %cst_7 = arith.constant 1.000000e+00 : f32
    %cst_8 = arith.constant 0.000000e+00 : f32
    %15 = vector.broadcast %cst_7 : f32 to vector<4x256xf32>
    %16 = vector.broadcast %cst_8 : f32 to vector<4x256xf32>
    %17 = arith.select %14, %15, %16 : vector<4x256xi1>, vector<4x256xf32>
    %cst_9 = arith.constant dense<0x7F800000> : vector<256xf32>
    %18 = vector.multi_reduction <minimumf>, %17, %cst_9 [0] : vector<4x256xf32> to vector<256xf32>
    %cst_10 = arith.constant 0.000000e+00 : f32
    %19 = vector.broadcast %cst_10 : f32 to vector<256xf32>
    %20 = arith.cmpf ogt, %18, %19 : vector<256xf32>
    %21 = vector.shape_cast %20 : vector<256xi1> to vector<1x256xi1>
    %22 = arith.andi %21, %12 : vector<1x256xi1>
    %23 = arith.subf %4, %6 : vector<4x256xf32>
    %24 = math.absf %23 : vector<4x256xf32>
    %cst_11 = arith.constant dense<0.000000e+00> : vector<256xf32>
    %25 = vector.multi_reduction <add>, %24, %cst_11 [0] : vector<4x256xf32> to vector<256xf32>
    %26 = vector.shape_cast %25 : vector<256xf32> to vector<1x256xf32>
    %c0_12 = arith.constant 0 : index
    %c0_13 = arith.constant 0 : index
    %c0_14 = arith.constant 0 : index
    %27 = vector.load %arg4[%c0_12, %c0_13, %c0_14] : memref<1x1x256xf32, #tpu.memory_space<vmem>>, vector<1x1x256xf32>
    %28 = vector.shape_cast %27 : vector<1x1x256xf32> to vector<1x256xf32>
    %cst_15 = arith.constant 0.000000e+00 : f32
    %29 = vector.broadcast %cst_15 : f32 to vector<1x256xf32>
    %30 = arith.select %22, %26, %29 : vector<1x256xi1>, vector<1x256xf32>
    %31 = arith.addf %28, %30 : vector<1x256xf32>
    %c0_16 = arith.constant 0 : index
    %c0_17 = arith.constant 0 : index
    %c0_18 = arith.constant 0 : index
    %32 = vector.load %arg4[%c0_16, %c0_17, %c0_18] : memref<1x1x256xf32, #tpu.memory_space<vmem>>, vector<1x1x256xf32>
    %33 = vector.shape_cast %32 : vector<1x1x256xf32> to vector<1x256xf32>
    %34 = vector.shape_cast %31 : vector<1x256xf32> to vector<1x1x256xf32>
    tpu.vector_store %arg4[%c0_16, %c0_17, %c0_18], %34 {strides = array<i32>} : memref<1x1x256xf32, #tpu.memory_space<vmem>>, vector<1x1x256xf32>,
    %c0_19 = arith.constant 0 : index
    %c0_20 = arith.constant 0 : index
    %c0_21 = arith.constant 0 : index
    %35 = vector.load %arg5[%c0_19, %c0_20, %c0_21] : memref<1x1x256xf32, #tpu.memory_space<vmem>>, vector<1x1x256xf32>
    %36 = vector.shape_cast %35 : vector<1x1x256xf32> to vector<1x256xf32>
    %37 = arith.extui %22 : vector<1x256xi1> to vector<1x256xi32>
    %38 = arith.sitofp %37 : vector<1x256xi32> to vector<1x256xf32>
    %39 = arith.addf %36, %38 : vector<1x256xf32>
    %c0_22 = arith.constant 0 : index
    %c0_23 = arith.constant 0 : index
    %c0_24 = arith.constant 0 : index
    %40 = vector.load %arg5[%c0_22, %c0_23, %c0_24] : memref<1x1x256xf32, #tpu.memory_space<vmem>>, vector<1x1x256xf32>
    %41 = vector.shape_cast %40 : vector<1x1x256xf32> to vector<1x256xf32>
    %42 = vector.shape_cast %39 : vector<1x256xf32> to vector<1x1x256xf32>
    tpu.vector_store %arg5[%c0_22, %c0_23, %c0_24], %42 {strides = array<i32>} : memref<1x1x256xf32, #tpu.memory_space<vmem>>, vector<1x1x256xf32>,
    return
  }
  func.func @transform_0(%arg0: i32, %arg1: i32) -> (i32, i32, i32) {
    %c0_i32 = arith.constant 0 : i32
    %c0_i32_0 = arith.constant 0 : i32
    return %arg0, %c0_i32, %arg1 : i32, i32, i32
  }
  func.func @transform_1(%arg0: i32, %arg1: i32) -> (i32, i32, i32) {
    %c0_i32 = arith.constant 0 : i32
    %c0_i32_0 = arith.constant 0 : i32
    return %arg0, %c0_i32, %arg1 : i32, i32, i32
  }
  func.func @transform_2(%arg0: i32, %arg1: i32) -> (i32, i32, i32) {
    %c0_i32 = arith.constant 0 : i32
    %c0_i32_0 = arith.constant 0 : i32
    %c0_i32_1 = arith.constant 0 : i32
    return %arg0, %c0_i32, %c0_i32_0 : i32, i32, i32
  }
  func.func @transform_3(%arg0: i32, %arg1: i32) -> (i32, i32, i32) {
    %c0_i32 = arith.constant 0 : i32
    %c0_i32_0 = arith.constant 0 : i32
    %c0_i32_1 = arith.constant 0 : i32
    return %arg0, %c0_i32, %c0_i32_0 : i32, i32, i32
  }
}

</mosaic_0001>

<bundles_post_ra>
// kernel: tpu_custom_call.1
= control target key start
LH: loop header
LB: loop body
LE: loop exit
PB: predicated region body
PF: predicated region fallthrough
CT: control target
= control target key end

     0   :  { %9 = vsyncpa [#allocation3], 0  ;;  %s1010_s0 = inlined_call_operand.hbm [shape: f32[2,4,256], index: 0, kind: input, shape index: {}]   ;;  %s1011_s1 = inlined_call_operand.hbm [shape: f32[2,4,256], index: 1, kind: input, shape index: {}]   ;;  %s1012_s2 = inlined_call_operand.hbm [shape: f32[2,1,256], index: 2, kind: output, shape index: {0}]   ;;  %s1013_s3 = inlined_call_operand.hbm [shape: f32[2,1,256], index: 3, kind: output, shape index: {1}]  }
   0x1   :  { %11 = vsyncpa [#allocation3 + $0x1], 0 }
   0x2   :  { %12 = vsyncpa [#allocation6], 0 }
   0x3   :  { %14 = vsyncpa [#allocation6 + $0x1], 0 }
   0x4   :  { %15 = vsyncpa [#allocation4], 0 }
   0x5   :  { %17 = vsyncpa [#allocation4 + $0x1], 0 }
   0x6   :  { %18 = vsyncpa [#allocation9], 0 }
   0x7   :  { %20 = vsyncpa [#allocation9 + $0x1], 0  ;;  %s833_s12 = smov 0   ;;  %s835_s13 = smov 0  }
   0x8   :  { %s837_s14 = smov 0   ;;  %s839_s15 = smov 0  }
   0x9   :  { %s841_s16 = smov 0   ;;  %s843_s17 = smov 0  }
   0xa LB: > { %s534_s18 = sadd.s32 4294967295, %s810_s17   ;;  %s535_s19 = sadd.s32 4294967294, %s810_s17   ;;  %s810_s17 = sphi %s843_s17, %s26_s17   ;;  %s806_s16 = sphi %s841_s16, %s1024_s16   ;;  %s802_s15 = sphi %s839_s15, %s1023_s15   ;;  %s798_s14 = sphi %s837_s14, %s1022_s14   ;;  %s794_s13 = sphi %s835_s13, %s1021_s13   ;;  %s790_s12 = sphi %s833_s12, %s1020_s12  }
   0xb   : > { %s38_s20 = sadd.s32 1, %s806_s16  ;;  %s47_s21 = sadd.s32 1, %s798_s14 }
   0xc   : > { %p40_p0 = scmp.ge.s32.totalorder %s38_s20, 2  ;;  %p54_p1 = scmp.ne.s32.totalorder %s798_s14, %s794_s13 }
   0xd   : > { %p55_p2 = scmp.eq.s32.totalorder %s810_s17, 0  ;;  %p60_p3 = scmp.ne.s32.totalorder %s794_s13, %s790_s12 }
   0xe   : > { %s1026_s20 = smov (%p40_p0, %s38_s20), 0  ;;  %p61_p5 = scmp.eq.s32.totalorder %s534_s18, 0 }
   0xf   : > { %p874_p4 = por %p55_p2, %p54_p1  ;;  %s42_s23 = ssub.s32 %s806_s16, %s1026_s20 }
  0x10   : > { %p112_p6 = scmp.eq.s32.totalorder %s534_s18, 1  ;;  %p45_p7 = scmp.eq.s32.totalorder %s42_s23, 0 }
  0x11   : > { %p880_p8 = por %p61_p5, %p60_p3  ;;  %p118_p10 = scmp.eq.s32.totalorder %s535_s19, 1 }
  0x12   : > { %p884_p9 = por %p112_p6, %p54_p1  ;;  %p537_p12 = scmp.ge.s32.totalorder %s810_s17, 2 }
  0x13   : > { %s889_s26 = scalar_select %p45_p7, %s798_s14, %s47_s21  }
  0x14   : > { %p891_p11 = por %p118_p10, %p60_p3  ;;  %p581_p13 = scmp.lt.s32.totalorder %s810_s17, 2 }
  0x15   : > { %s164_s28 = sand.u32 1, %s798_s14   ;;  %s557_s30 = sshll.u32 %s806_s16, 3 }
  0x16   : > { %s538_s29 = sshll.u32 %s164_s28, 3  ;;  %s175_s6 = scalar_lea.hbm %s1010_s0, %s557_s30 }
  0x17   : > { %s168_s7 = scalar_lea.vmem [#allocation2], %s538_s29  ;;  %s177_s9 = sshll.u32 %s175_s6, 4  ;;  %s178_s9 = int_to_ptr.hbm [resolvable:$true] %s177_s9 }
  0x18   : > { %s179_s8 = sshll.u32 %s168_s7, 4  ;;  %p568_p0 = pnand %p581_p13, %p874_p4  ;;  %s180_s8 = int_to_ptr.vmem [resolvable:$true] %s179_s8 }
  0x19   : > { %p544_p1 = scmp.ge.s32.totalorder %s810_s17, 1  ;;  %p206_p2 = scmp.lt.s32.totalorder %s810_s17, 3 }
  0x1a   : > { %s165_s10 = scalar_lea.sflag [#allocation3], %s164_s28  ;;  %s197_s19 = scalar_lea.hbm %s1011_s1, %s557_s30 }
  0x1b   : > { %570 = dma.hbm_to_vmem [thread:$0]  (!%p568_p0), %s178_s9, 128, %s180_s8, %s165_s10  }
  0x1c   : > { %p207_p3 = pnand %p544_p1, %p206_p2  ;;  %s190_s21 = scalar_lea.vmem [#allocation5], %s538_s29 }
  0x1d   : > { %s201_s23 = sshll.u32 %s190_s21, 4  ;;  %s199_s4 = sshll.u32 %s197_s19, 4  ;;  %s202_s23 = int_to_ptr.vmem [resolvable:$true] %s201_s23  ;;  %s200_s4 = int_to_ptr.hbm [resolvable:$true] %s199_s4 }
  0x1e   : > { %s187_s5 = scalar_lea.sflag [#allocation6], %s164_s28  ;;  %210 = sbr.rel (%p207_p3) target bundleno = 88 (0x58), region = 28 }
  0x1f   : > { %573 = dma.hbm_to_vmem [thread:$0]  (!%p568_p0), %s200_s4, 128, %s202_s23, %s187_s5  }
  0x20   : > { %s910_s22 = sand.u32 (!%p207_p3), 1, %s794_s13  }
  0x21   : > { %s545_s6 = sshll.u32 (!%p207_p3), %s910_s22, 3  ;;  %s213_s7 = scalar_lea.sflag (!%p207_p3), [#allocation3], %s910_s22 }
  0x22   : > { %s216_s8 = scalar_lea.vmem (!%p207_p3), [#allocation2], %s545_s6 }
  0x23   : > { %773 = dma.done.wait (%p880_p8), %s213_s7, 128  }
  0x24   : > { %775 = vsyncadd (%p880_p8), %s213_s7, 4294967168  ;;  %s223_s29 = scalar_lea.sflag [#allocation6], %s910_s22  ;;  %s226_s28 = scalar_lea.vmem [#allocation5], %s545_s6 }
  0x25   : > { %777 = dma.done.wait (%p880_p8), %s223_s29, 128  }
  0x26   : > { %779 = vsyncadd (%p880_p8), %s223_s29, 4294967168  ;;  %s547_s30 = sshll.u32 %s910_s22, 1  ;;  %v266_v0 = vlaneseq  ;;  %v812_v2 = vmov 0.0   ;;  %v272_v3 = vld [vmem:[%s216_s8] sm:$0xff]  ;;  %v273_v4 = vld [vmem:[%s226_s28] sm:$0xff]  ;;  %vm291_vm2 = vcmask 1043456  }
  0x27   : > { %s928_s9 = scalar_lea.vmem [#allocation8], %s547_s30  ;;  %s933_s10 = scalar_lea.vmem [#allocation7], %s547_s30  ;;  %vm283_vm1 = vcmp.ne.f32.partialorder %v273_v4, 255.0  ;;  %v310_v6 = vsub.f32 %v272_v3, %v273_v4  ;;  %vm338_vm5 = vcmask 1040384  }
  0x28   : > { %vm924_vm0 = vcmp.lt.s32.totalorder %v266_v0, 256  ;;  %v284_v5 = vsel %vm283_vm1, 1.0, %v812_v2  ;;  %s553_s24 = sshll.u32 %s802_s15, 1  ;;  %s391_s15 = sshll.u32 %s928_s9, 4  ;;  %s392_s15 = int_to_ptr.vmem [resolvable:$true] %s391_s15 }
  0x29   : > { %271 = vst.msk [vmem:[%s928_s9] sm:$0x3] %vm924_vm0, %v812_v2  ;;  %v311_v7 = vand.u32 2147483647, %v310_v6  ;;  %s389_s19 = scalar_lea.hbm %s1013_s3, %s553_s24  ;;  %s375_s5 = scalar_lea.hbm %s1012_s2, %s553_s24 }
  0x2a   : > { %270 = vst.msk [vmem:[%s933_s10] sm:$0x3] %vm924_vm0, %v812_v2  ;;  %s393_s21 = sshll.u32 %s389_s19, 4  ;;  %s365_s6 = scalar_lea.sflag [#allocation9], %s910_s22  ;;  %s394_s21 = int_to_ptr.hbm [resolvable:$true] %s393_s21 }
  0x2b   : > { %286 = vst [vmem:[#allocation1] ss:$2 sm:$0xff] %v284_v5  ;;  %s706_s7 = sshra.s32 %s394_s21, 4  ;;  %s712_s30 = scalar_lea.hbm %s1013_s3, 4  ;;  %s707_s7 = int_to_ptr.hbm [resolvable:$true] %s706_s7 }
  0x2c   : > { %s708_s8 = scalar_lea.hbm %s707_s7, 2  ;;  %p713_p7 = scmp.lt.s32.totalorder %s707_s7, %s1013_s3 }
  0x2d   : > { %p709_p4 = scmp.ne.s32.totalorder %s707_s7, %s708_s8  ;;  %p714_p8 = scmp.lt.s32.totalorder %s712_s30, %s708_s8 }
  0x2f   : > { %p710_p5 = pnand %p709_p4, %p884_p9  ;;  %p715_p10 = por %p714_p8, %p713_p7 }
  0x30   : > { %v347_v37 = vld [vmem:[%s928_s9] sm:$0x3] }
  0x31   : > { %p711_p6 = pneg %p710_p5 }
  0x32   : > { %v287_v8 = vld.sshfl [vmem:[#allocation1] sm:$0xff pattern:$0x75316420]  ;;  %v288_v9 = vld.sshfl [vmem:[#allocation1 + $0x8] sm:$0xff pattern:$0x75316420] }
  0x33   : > { %v292_v10 = vsel %vm291_vm2, %v287_v8, inf  ;;  %v299_v11 = vsel %vm291_vm2, %v288_v9, inf  ;;  %313 = vst [vmem:[#allocation1] ss:$2 sm:$0xff] %v311_v7  ;;  %p716_p13 = pnand %p715_p10, %p711_p6 }
  0x34   : > { %v293_v12 = vrot.slane %v292_v10, 4  ;;  %v300_v13 = vrot.slane %v299_v11, 4 }
  0x36   : > { %v294_v14 = vmin.f32 %v292_v10, %v293_v12  ;;  %v301_v15 = vmin.f32 %v299_v11, %v300_v13 }
  0x38   : > { %v295_v16 = vrot.slane %v294_v14, 2  ;;  %v302_v17 = vrot.slane %v301_v15, 2 }
  0x3a   : > { %v296_v18 = vmin.f32 %v294_v14, %v295_v16  ;;  %v303_v19 = vmin.f32 %v301_v15, %v302_v17  ;;  %v314_v20 = vld.sshfl [vmem:[#allocation1] sm:$0xff pattern:$0x75316420]  ;;  %v315_v21 = vld.sshfl [vmem:[#allocation1 + $0x8] sm:$0xff pattern:$0x75316420] }
  0x3b   : > { %v318_v22 = vsel %vm291_vm2, %v314_v20, 0.0  ;;  %v325_v23 = vsel %vm291_vm2, %v315_v21, 0.0 }
  0x3c   : > { %v297_v24 = vrot.slane %v296_v18, 1  ;;  %v304_v25 = vrot.slane %v303_v19, 1  ;;  %v319_v26 = vrot.slane %v318_v22, 4  ;;  %v326_v27 = vrot.slane %v325_v23, 4 }
  0x3e   : > { %v298_v28 = vmin.f32 %v296_v18, %v297_v24  ;;  %v305_v29 = vmin.f32 %v303_v19, %v304_v25  ;;  %v320_v30 = vadd.f32 %v319_v26, %v318_v22  ;;  %v327_v31 = vadd.f32 %v326_v27, %v325_v23 }
  0x40   : > { %vm306_vm3 = vcmp.gt.f32.partialorder %v298_v28, 0.0  ;;  %vm307_vm4 = vcmp.gt.f32.partialorder %v305_v29, 0.0  ;;  %v328_v32 = vrot.slane %v327_v31, 2  ;;  %v321_v33 = vrot.slane %v320_v30, 2 }
  0x41   : > { %v550_v34 = vsel %vm307_vm4, 1.0, %v812_v2  ;;  %v549_v39 = vsel %vm306_vm3, 1.0, %v812_v2 }
  0x42   : > { %v329_v35 = vadd.f32 %v328_v32, %v327_v31  ;;  %v354_v36 = vrot.slane %v550_v34, 7  ;;  %v322_v38 = vadd.f32 %v321_v33, %v320_v30 }
  0x44   : > { %v330_v40 = vrot.slane %v329_v35, 1  ;;  %v355_v41 = vsel %vm338_vm5, %v549_v39, %v354_v36  ;;  %v323_v42 = vrot.slane %v322_v38, 1 }
  0x45   : > { %v357_v43 = vadd.f32 %v355_v41, %v347_v37 }
  0x46   : > { %v331_v44 = vadd.f32 %v330_v40, %v329_v35  ;;  %v324_v45 = vadd.f32 %v323_v42, %v322_v38 }
  0x47   : > { %358 = vst.msk [vmem:[%s928_s9] sm:$0x3] %vm924_vm0, %v357_v43 }
  0x48   : > { %v334_v46 = vsel %vm307_vm4, %v331_v44, 0.0 }
  0x49   : > { %719 = shalt.err (!%p716_p13)
}
  0x4a   : > { %564 = dma.vmem_to_hbm [thread:$0]  (%p884_p9), %s392_s15, 32, %s394_s21, %s365_s6   ;;  %v337_v47 = vrot.slane %v334_v46, 7  ;;  %v332_v48 = vld [vmem:[%s933_s10] sm:$0x3]  ;;  %v333_v49 = vsel %vm306_vm3, %v324_v45, 0.0 }
  0x4b   : > { %s377_s9 = sshll.u32 %s933_s10, 4  ;;  %s379_s24 = sshll.u32 %s375_s5, 4  ;;  %s378_s9 = int_to_ptr.vmem [resolvable:$true] %s377_s9  ;;  %s380_s24 = int_to_ptr.hbm [resolvable:$true] %s379_s24 }
  0x4c   : > { %v339_v50 = vsel %vm338_vm5, %v333_v49, %v337_v47  ;;  %s360_s19 = scalar_lea.sflag [#allocation4], %s910_s22  ;;  %s734_s23 = sshra.s32 %s380_s24, 4  ;;  %s735_s23 = int_to_ptr.hbm [resolvable:$true] %s734_s23 }
  0x4d   : > { %v341_v51 = vadd.f32 %v339_v50, %v332_v48  ;;  %s736_s4 = scalar_lea.hbm %s735_s23, 2  ;;  %s740_s5 = scalar_lea.hbm %s1012_s2, 4 }
  0x4e   : > { %p737_p0 = scmp.ne.s32.totalorder %s735_s23, %s736_s4  ;;  %p741_p3 = scmp.lt.s32.totalorder %s735_s23, %s1012_s2 }
  0x4f   : > { %346 = vst.msk [vmem:[%s933_s10] sm:$0x3] %vm924_vm0, %v341_v51  ;;  %p742_p4 = scmp.lt.s32.totalorder %s740_s5, %s736_s4 }
  0x50   : > { %p738_p1 = pnand %p737_p0, %p884_p9 }
  0x51   : > { %p743_p5 = por %p742_p4, %p741_p3 }
  0x52   : > { %p739_p2 = pneg %p738_p1 }
  0x54   : > { %p744_p6 = pnand %p743_p5, %p739_p2 }
  0x56   : > { %747 = shalt.err (!%p744_p6)
}
  0x57   : > { %563 = dma.vmem_to_hbm [thread:$0]  (%p884_p9), %s378_s9, 32, %s380_s24, %s360_s19  }
  0x58 PF: > { %s405_s22 = sand.u32 1, %s790_s12   ;;  %p575_p7 = pnand %p537_p12, %p891_p11 }
  0x59   : > { %s406_s10 = scalar_lea.sflag [#allocation4], %s405_s22 }
  0x5a   : > { %p576_p8 = pneg %p575_p7 }
  0x5c   : > { %781 = dma.done.wait (%p576_p8), %s406_s10, 32  }
  0x5d   : > { %783 = vsyncadd (%p576_p8), %s406_s10, 4294967264  ;;  %s416_s8 = scalar_lea.sflag [#allocation9], %s405_s22 }
  0x5e   : > { %785 = dma.done.wait (%p576_p8), %s416_s8, 32  }
  0x5f   : > { %787 = vsyncadd (%p576_p8), %s416_s8, 4294967264  ;;  %s26_s17 = sadd.s32 1, %s810_s17   ;;  %s1020_s12 = smov %s794_s13 }
  0x60   : > { %p23_p10 = scmp.ge.s32.totalorder %s26_s17, 4   ;;  %s1021_s13 = smov %s798_s14 }
  0x61   : > { %s1022_s14 = smov %s889_s26  ;;  %s1023_s15 = smov %s806_s16 }
  0x62   : > { %s1024_s16 = smov %s1026_s20  ;;  %25 = sbr.rel (!%p23_p10) target bundleno = 10 (0xa), region = 107 }
  0x67   :  { %422 = vsyncpa [#allocation3], 1 }
  0x68   :  { %424 = vsyncpa [#allocation3 + $0x1], 1 }
  0x69   :  { %425 = vsyncpa [#allocation6], 1 }
  0x6a   :  { %427 = vsyncpa [#allocation6 + $0x1], 1 }
  0x6b   :  { %428 = vsyncpa [#allocation4], 1 }
  0x6c   :  { %430 = vsyncpa [#allocation4 + $0x1], 1 }
  0x6d   :  { %431 = vsyncpa [#allocation9], 1 }
  0x6e   :  { %433 = vsyncpa [#allocation9 + $0x1], 1 }

</bundles_post_ra>
